<compile_context>
chip_gen: v7x
topology: tpu7x:2x2x1
jax: 0.10.0
libtpu: 0.0.40
codegen_flags: <defaults>
</compile_context>

<pallas_src>
import math

import jax
import jax.numpy as jnp
from jax.experimental import pallas as pl
from jax.experimental.pallas import tpu as pltpu


def _cdiv(a, b):
    return -(-a // b)


def _round_up(a, b):
    return _cdiv(a, b) * b


def _pack_factor(k, o, lane=128, max_width=2048, max_weight_bytes=8 << 20):
    """Smallest P such that P*k and P*o are multiples of `lane`, bounded so the
    block-diagonal folded weight stays small enough for VMEM."""
    pk = lane // math.gcd(k, lane)
    po = lane // math.gcd(o, lane)
    p = pk * po // math.gcd(pk, po)            # lcm(pk, po)
    if (p * k > max_width or p * o > max_width
            or (p * k) * (p * o) * 4 > max_weight_bytes):
        return 1                                # fall back to unpacked path
    return p


def _const_block_spec(shape):
    """Grid-invariant block (index map is constant): ask for a single buffer so
    the large folded weight does not get double-buffered in VMEM."""
    idx = lambda i: (0, 0)
    try:
        return pl.BlockSpec(shape, idx, pipeline_mode=pl.Buffered(1))
    except (TypeError, AttributeError, ValueError):
        return pl.BlockSpec(shape, idx)         # older JAX: default buffering


def _gcn_gemm_kernel(x_ref, w_ref, b_ref, o_ref):
    # x_ref: (tm, PK)  input dtype (f32/bf16) -- lane-dense packed rows of x
    # w_ref: (PK, PO)  f32 -- |W| with adjacency pre-folded (block-diagonal)
    # b_ref: (1,  PO)  f32 -- bias (tiled per packed row-group)
    # o_ref: (tm, PO)  input dtype
    acc = jnp.dot(x_ref[...].astype(jnp.float32), w_ref[...],
                  preferred_element_type=jnp.float32)
    o_ref[...] = (acc + b_ref[...]).astype(o_ref.dtype)


def monotonic_gcn_layer(input_features, adj_matrix, weight, bias, *,
                        n_agents, input_feature_size, output_feature_size,
                        target_tile_bytes=2 << 20):
    """input_features: (B, T, n_agents * input_feature_size)."""
    B, T, in_size = input_features.shape
    K = n_agents * input_feature_size
    O = n_agents * output_feature_size
    assert in_size == K
    M = B * T

    f32 = jnp.float32
    if input_features.dtype in (jnp.float32, jnp.bfloat16):
        x_dtype = input_features.dtype          # stream bf16 natively if given
    else:
        x_dtype = f32
        input_features = input_features.astype(f32)
    x_flat = input_features.reshape(M, K)

    # --- one-time weight prep in the wrapper (exact fold) --------------------
    w_abs = jnp.abs(weight.astype(f32)).reshape(n_agents, input_feature_size, O)
    # W_mix[c, f, o] = sum_a adj[a, c] * |W|[a, f, o]
    w_mix = jnp.einsum("ac,afo->cfo", adj_matrix.astype(f32), w_abs).reshape(K, O)
    b_row = bias.astype(f32).reshape(1, O)

    # --- lane-dense packing (no copy of x in the common case) ----------------
    P = _pack_factor(K, O)
    if P > 1:
        w_blk = jnp.kron(jnp.eye(P, dtype=f32), w_mix)   # (P*K, P*O) block-diag
        b_blk = jnp.tile(b_row, (1, P))                  # (1, P*O)
        PK, PO = P * K, P * O
        O_pad = O
        pad_rows = (-M) % P
        if pad_rows:
            # TODO(synk): rare path (M % P != 0) still costs one copy of x.
            x_flat = jnp.concatenate(
                [x_flat, jnp.zeros((pad_rows, K), x_flat.dtype)], axis=0)
        Mp = (M + pad_rows) // P
        x_in = x_flat.reshape(Mp, PK)                    # bit-identical view
    else:
        # Fallback for awkward/large K,O: keep x untouched (full-K block); pad
        # only the tiny weight's output columns to a 128 multiple so stores
        # stay lane-dense, slice the extra columns off afterwards.
        O_pad = _round_up(O, 128)
        if O_pad != O:
            w_mix = jnp.pad(w_mix, ((0, 0), (0, O_pad - O)))
            b_row = jnp.pad(b_row, ((0, 0), (0, O_pad - O)))
        w_blk, b_blk = w_mix, b_row
        PK, PO = K, O_pad
        pad_rows = 0
        Mp = M
        x_in = x_flat

    # --- row-tile sizing: by bytes, megacore-aware, VMEM-budgeted ------------
    itemsize = jnp.dtype(x_dtype).itemsize
    row_mult = (8 * 4) // itemsize              # 8 rows for f32, 16 for bf16

    def _vmem_need(rows):                       # conservative: 2 bufs everywhere
        return (2 * rows * PK * itemsize + 2 * rows * PO * itemsize
                + 2 * PK * PO * 4 + 2 * PO * 4)

    if Mp <= row_mult:
        tm = Mp                                 # single full-extent block
    else:
        row_bytes = itemsize * PK
        tm = max(target_tile_bytes // row_bytes, row_mult)
        tm = _round_up(min(tm, 8192), row_mult)
        tm = min(tm, _round_up(Mp, row_mult))
        # v7x megacore: keep >= 2 (preferably 4) grid steps when M allows it.
        for want in (4, 2):
            if Mp >= want * row_mult and _cdiv(Mp, tm) < want:
                tm = max(_round_up(_cdiv(Mp, want), row_mult), row_mult)
                break
        while tm > row_mult and _vmem_need(tm) > (32 << 20):
            tm = max(_round_up(tm // 2, row_mult), row_mult)

    grid = (_cdiv(Mp, tm),)
    vmem_limit = int(min(max(_vmem_need(tm) + (4 << 20), 16 << 20), 48 << 20))

    cost = pl.CostEstimate(
        flops=2 * Mp * PK * PO,
        bytes_accessed=(Mp * PK * itemsize + Mp * PO * itemsize
                        + PK * PO * 4 + PO * 4),
        transcendentals=0)

    out_packed = pl.pallas_call(
        _gcn_gemm_kernel,
        out_shape=jax.ShapeDtypeStruct((Mp, PO), x_dtype),
        grid_spec=pltpu.PrefetchScalarGridSpec(
            num_scalar_prefetch=0,
            grid=grid,
            in_specs=[
                pl.BlockSpec((tm, PK), lambda i: (i, 0)),   # x tile (streamed)
                _const_block_spec((PK, PO)),                # folded weight
                _const_block_spec((1, PO)),                 # bias row
            ],
            out_specs=pl.BlockSpec((tm, PO), lambda i: (i, 0)),
        ),
        compiler_params=pltpu.CompilerParams(
            dimension_semantics=("parallel",),              # shard M over TCs
            vmem_limit_bytes=vmem_limit),
        cost_estimate=cost,
    )(x_in, w_blk, b_blk)

    # --- epilogue: bit-identical reshapes in the common (unpadded) case ------
    if P > 1:
        out = out_packed.reshape(Mp * P, O)
        if pad_rows:
            out = out[:M]
    else:
        out = out_packed if O_pad == O else out_packed[:, :O]
    return out.reshape(B, T, n_agents, output_feature_size)


def _reference(input_features, adj_matrix, weight, bias, *,
               n_agents, input_feature_size, output_feature_size):
    B, T, _ = input_features.shape
    x4 = input_features.reshape(B, T, n_agents, input_feature_size)
    feat = jnp.einsum("ac,btcf->btaf", adj_matrix, x4)
    feat = feat.reshape(B, T, n_agents * input_feature_size)
    out = feat @ jnp.abs(weight) + bias
    return out.reshape(B, T, n_agents, output_feature_size)


if __name__ == "__main__":
    # Small shapes consistent with the module.
    n_agents = 4
    input_feature_size = 8
    output_feature_size = 8
    B, T = 2, 8

    input_size = n_agents * input_feature_size
    output_size = n_agents * output_feature_size

    key = jax.random.PRNGKey(0)
    k_x, k_w = jax.random.split(key)

    input_features = jax.random.normal(
        k_x, (B, T, input_size), dtype=jnp.float32)

    # Deterministic parameters (module: weight ~ randn, bias = zeros).
    weight = jax.random.normal(k_w, (input_size, output_size), dtype=jnp.float32)
    bias = jnp.zeros((output_size,), dtype=jnp.float32)

    # Deterministic normalized adjacency (self-loops + full connectivity).
    adj_matrix = (jnp.eye(n_agents, dtype=jnp.float32)
                  + jnp.ones((n_agents, n_agents), dtype=jnp.float32))
    adj_matrix = adj_matrix / jnp.sum(adj_matrix, axis=-1, keepdims=True)

    out = monotonic_gcn_layer(
        input_features, adj_matrix, weight, bias,
        n_agents=n_agents,
        input_feature_size=input_feature_size,
        output_feature_size=output_feature_size,
    )
    out = jax.block_until_ready(out)

    ref = _reference(
        input_features, adj_matrix, weight, bias,
        n_agents=n_agents,
        input_feature_size=input_feature_size,
        output_feature_size=output_feature_size,
    )

    assert out.shape == (B, T, n_agents, output_feature_size)
    assert jnp.allclose(out.astype(jnp.float32), ref, atol=1e-4, rtol=1e-4), (
        float(jnp.max(jnp.abs(out.astype(jnp.float32) - ref))))
    print("KERNEL_OK")
</pallas_src>

<mosaic_0001>
module attributes {stable_mosaic.version = 11 : i64} {
  func.func @_gcn_gemm_kernel(%arg0: i32, %arg1: memref<4x128xf32, #tpu.memory_space<vmem>>, %arg2: memref<128x128xf32, #tpu.memory_space<vmem>>, %arg3: memref<1x128xf32, #tpu.memory_space<vmem>>, %arg4: memref<4x128xf32, #tpu.memory_space<vmem>>) attributes {dimension_semantics = [#tpu.dimension_semantics<parallel>], iteration_bounds = array<i64: 1>, scalar_prefetch = 0 : i64, scratch_operands = 0 : i64, tpu.core_type = #tpu.core_type<tc>, window_params = [{transform_indices = @transform_0, window_bounds = array<i64: 4, 128>}, {pipeline_mode = #tpu.pipeline_mode<synchronous>, transform_indices = @transform_1, window_bounds = array<i64: 128, 128>}, {pipeline_mode = #tpu.pipeline_mode<synchronous>, transform_indices = @transform_2, window_bounds = array<i64: 1, 128>}, {transform_indices = @transform_3, window_bounds = array<i64: 4, 128>}]} {
    %c0 = arith.constant 0 : index
    %c0_0 = arith.constant 0 : index
    %0 = vector.load %arg1[%c0, %c0_0] : memref<4x128xf32, #tpu.memory_space<vmem>>, vector<4x128xf32>
    %c0_1 = arith.constant 0 : index
    %c0_2 = arith.constant 0 : index
    %1 = vector.load %arg2[%c0_1, %c0_2] : memref<128x128xf32, #tpu.memory_space<vmem>>, vector<128x128xf32>
    %cst = arith.constant dense<0.000000e+00> : vector<4x128xf32>
    %2 = tpu.matmul %0, %1, %cst {dimension_numbers = #tpu.dot_dimension_numbers<[1], [0], [0], [1], [0, 0, 1, 1], [], []>} : vector<4x128xf32>, vector<128x128xf32>, vector<4x128xf32> -> vector<4x128xf32>
    %c0_3 = arith.constant 0 : index
    %c0_4 = arith.constant 0 : index
    %3 = vector.load %arg3[%c0_3, %c0_4] : memref<1x128xf32, #tpu.memory_space<vmem>>, vector<1x128xf32>
    %4 = vector.broadcast %3 : vector<1x128xf32> to vector<4x128xf32>
    %5 = arith.addf %2, %4 : vector<4x128xf32>
    %c0_5 = arith.constant 0 : index
    %c0_6 = arith.constant 0 : index
    %6 = vector.load %arg4[%c0_5, %c0_6] : memref<4x128xf32, #tpu.memory_space<vmem>>, vector<4x128xf32>
    tpu.vector_store %arg4[%c0_5, %c0_6], %5 {strides = array<i32>} : memref<4x128xf32, #tpu.memory_space<vmem>>, vector<4x128xf32>,
    return
  }
  func.func @transform_0(%arg0: i32) -> (i32, i32) {
    %c0_i32 = arith.constant 0 : i32
    %c0_i32_0 = arith.constant 0 : i32
    return %arg0, %c0_i32 : i32, i32
  }
  func.func @transform_1(%arg0: i32) -> (i32, i32) {
    %c0_i32 = arith.constant 0 : i32
    %c0_i32_0 = arith.constant 0 : i32
    %c0_i32_1 = arith.constant 0 : i32
    return %c0_i32, %c0_i32_0 : i32, i32
  }
  func.func @transform_2(%arg0: i32) -> (i32, i32) {
    %c0_i32 = arith.constant 0 : i32
    %c0_i32_0 = arith.constant 0 : i32
    %c0_i32_1 = arith.constant 0 : i32
    return %c0_i32, %c0_i32_0 : i32, i32
  }
  func.func @transform_3(%arg0: i32) -> (i32, i32) {
    %c0_i32 = arith.constant 0 : i32
    %c0_i32_0 = arith.constant 0 : i32
    return %arg0, %c0_i32 : i32, i32
  }
}

</mosaic_0001>

<bundles_post_ra>
// kernel: tpu_custom_call.1
= control target key start
LH: loop header
LB: loop body
LE: loop exit
PB: predicated region body
PF: predicated region fallthrough
CT: control target
= control target key end

     0   :  { %8 = vsyncpa [#allocation3], 0  ;;  %s383_s0 = inlined_call_operand.hbm [shape: f32[4,128], index: 0, kind: input, shape index: {}]   ;;  %s384_s1 = inlined_call_operand.hbm [shape: f32[128,128], index: 1, kind: input, shape index: {}]   ;;  %s385_s2 = inlined_call_operand.vmem [shape: f32[1,128], index: 2, kind: input, shape index: {}]   ;;  %s386_s3 = inlined_call_operand.hbm [shape: f32[4,128], index: 3, kind: output, shape index: {}]  }
   0x1   :  { %9 = vsyncpa [#allocation6], 0 }
   0x2   :  { %10 = vsyncpa [#allocation4], 0  ;;  %s309_s12 = smov [#allocation2]   ;;  %s310_s14 = smov [#allocation5]  }
   0x3   :  { %s17_s13 = sshll.u32 %s309_s12, 4  ;;  %s26_s15 = sshll.u32 %s310_s14, 4  ;;  %s18_s13 = int_to_ptr.vmem [resolvable:$true] %s17_s13  ;;  %s337_s15 = int_to_ptr.vmem [resolvable:$true] %s26_s15 }
   0x4   :  { %s237_s18 = scalar_lea.hbm %s383_s0, 64 }
   0x5   :  { %p238_p0 = scmp.ne.s32.totalorder %s383_s0, %s237_s18  ;;  %p241_p1 = scmp.lt.u32.totalorder %s237_s18, %s383_s0 }
   0x7   :  { %p243_p2 = pnand %p241_p1, %p238_p0 }
   0x9   :  { %246 = shalt.err (!%p243_p2)
}
   0xa   :  { %s247_s23 = scalar_lea.vmem %s18_s13, 64  ;;  %p252_p4 = scmp.lt.s32.totalorder %s18_s13, %s18_s13 }
   0xb   :  { %p248_p3 = scmp.ne.s32.totalorder %s18_s13, %s247_s23  ;;  %p253_p5 = scmp.lt.s32.totalorder %s247_s23, %s247_s23 }
   0xd   :  { %p254_p6 = por %p253_p5, %p252_p4 }
   0xf   :  { %p255_p7 = pnand %p254_p6, %p248_p3 }
  0x11   :  { %258 = shalt.err (!%p255_p7)
}
  0x12   :  { %20 = dma.hbm_to_vmem [thread:$0]  %s383_s0, 64, %s18_s13, [#allocation3]  }
  0x13   :  { %s259_s28 = scalar_lea.hbm %s384_s1, 2048 }
  0x14   :  { %p260_p8 = scmp.ne.s32.totalorder %s384_s1, %s259_s28  ;;  %p263_p9 = scmp.lt.u32.totalorder %s259_s28, %s384_s1 }
  0x16   :  { %p265_p10 = pnand %p263_p9, %p260_p8 }
  0x18   :  { %268 = shalt.err (!%p265_p10)
}
  0x19   :  { %s269_s6 = scalar_lea.vmem %s337_s15, 2048  ;;  %p274_p12 = scmp.lt.s32.totalorder %s337_s15, %s337_s15 }
  0x1a   :  { %p270_p11 = scmp.ne.s32.totalorder %s337_s15, %s269_s6  ;;  %p275_p13 = scmp.lt.s32.totalorder %s269_s6, %s269_s6 }
  0x1c   :  { %p276_p0 = por %p275_p13, %p274_p12 }
  0x1e   :  { %p277_p1 = pnand %p276_p0, %p270_p11 }
  0x20   :  { %280 = shalt.err (!%p277_p1)
}
  0x21   :  { %s311_s0 = smov 128   ;;  %s312_s7 = smov 8  }
  0x22   :  { %32 = dma.hbm_to_vmem [thread:$0]  %s384_s1, 2048, %s337_s15, [#allocation6], %s311_s0, %s311_s0, %s312_s7  }
  0x23   :  { %303 = dma.done.wait [#allocation3], 64  }
  0x24   :  { %304 = vsyncadd [#allocation3], 4294967232 }
  0x25   :  { %305 = dma.done.wait [#allocation6], 2048  }
  0x26   :  { %306 = vsyncadd [#allocation6], 4294965248  ;;  %v313_v0 = vmov 0.0|0.0   ;;  %vm314_vm0 = vmmov 0   ;;  %v315_v1 = vmov 0.0   ;;  %v42_v2 = vld [vmem:[#allocation5] sm:$0xff] }
  0x27   :  { %205 = vmatprep.subr.bf16.mxu0 %v313_v0  ;;  %202 = vmatprep.mubr.msk.f32.mxu0 %vm314_vm0, %v315_v1  ;;  %v43_v3 = vld [vmem:[#allocation5 + $0x8] sm:$0xff]  ;;  %v44_v4 = vld [vmem:[#allocation5 + $0x10] sm:$0xff]  ;;  %v45_v6 = vld [vmem:[#allocation5 + $0x18] sm:$0xff]  ;;  %s316_s11 = smov [#allocation7]  }
  0x28   :  { %v206_v5 = vpack.c.bf16 %v43_v3, %v42_v2  ;;  %v209_v7 = vpack.c.bf16 %v45_v6, %v44_v4  ;;  %v46_v8 = vld [vmem:[#allocation5 + $0x20] sm:$0xff]  ;;  %v47_v9 = vld [vmem:[#allocation5 + $0x28] sm:$0xff]  ;;  %v48_v11 = vld [vmem:[#allocation5 + $0x30] sm:$0xff]  ;;  %s142_s12 = sshll.u32 %s316_s11, 4  ;;  %s143_s12 = int_to_ptr.vmem [resolvable:$true] %s142_s12 }
  0x29   :  { %v212_v10 = vpack.c.bf16 %v47_v9, %v46_v8  ;;  %v49_v12 = vld [vmem:[#allocation5 + $0x38] sm:$0xff]  ;;  %v50_v14 = vld [vmem:[#allocation5 + $0x40] sm:$0xff]  ;;  %v51_v15 = vld [vmem:[#allocation5 + $0x48] sm:$0xff]  ;;  %s281_s13 = scalar_lea.vmem %s143_s12, 64  ;;  %p286_p3 = scmp.lt.s32.totalorder %s143_s12, %s143_s12 }
  0x2a   :  { %207 = vmatpush3.bf16.msra.mxu0 %v206_v5  ;;  %v215_v13 = vpack.c.bf16 %v49_v12, %v48_v11  ;;  %v218_v16 = vpack.c.bf16 %v51_v15, %v50_v14  ;;  %v52_v17 = vld [vmem:[#allocation5 + $0x50] sm:$0xff]  ;;  %v53_v18 = vld [vmem:[#allocation5 + $0x58] sm:$0xff]  ;;  %v54_v20 = vld [vmem:[#allocation5 + $0x60] sm:$0xff]  ;;  %p282_p2 = scmp.ne.s32.totalorder %s143_s12, %s281_s13  ;;  %p287_p4 = scmp.lt.s32.totalorder %s281_s13, %s281_s13 }
  0x2b   :  { %208 = vmatprep.subr.bf16.mxu0 %v313_v0  ;;  %v221_v19 = vpack.c.bf16 %v53_v18, %v52_v17  ;;  %v55_v21 = vld [vmem:[#allocation5 + $0x68] sm:$0xff]  ;;  %v56_v23 = vld [vmem:[#allocation5 + $0x70] sm:$0xff]  ;;  %v57_v24 = vld [vmem:[#allocation5 + $0x78] sm:$0xff] }
  0x2c   :  { %v224_v22 = vpack.c.bf16 %v55_v21, %v54_v20  ;;  %v227_v25 = vpack.c.bf16 %v57_v24, %v56_v23  ;;  %v41_v26 = vld [vmem:[#allocation2] sm:$0xf]  ;;  %p288_p5 = por %p287_p4, %p286_p3 }
  0x2d   :  { %v152_v27 = vld [vmem:[%s385_s2] ss:$0 sm:$0xff] }
  0x2e   :  { %210 = vmatpush3.bf16.msra.mxu0 %v209_v7  ;;  %p289_p6 = pnand %p288_p5, %p282_p2 }
  0x2f   :  { %211 = vmatprep.subr.bf16.mxu0 %v313_v0 }
  0x32   :  { %213 = vmatpush3.bf16.msra.mxu0 %v212_v10 }
  0x33   :  { %214 = vmatprep.subr.bf16.mxu0 %v313_v0 }
  0x36   :  { %216 = vmatpush3.bf16.msra.mxu0 %v215_v13 }
  0x37   :  { %217 = vmatprep.subr.bf16.mxu0 %v313_v0 }
  0x3a   :  { %219 = vmatpush3.bf16.msra.mxu0 %v218_v16 }
  0x3b   :  { %220 = vmatprep.subr.bf16.mxu0 %v313_v0 }
  0x3e   :  { %222 = vmatpush3.bf16.msra.mxu0 %v221_v19 }
  0x3f   :  { %223 = vmatprep.subr.bf16.mxu0 %v313_v0 }
  0x42   :  { %225 = vmatpush3.bf16.msra.mxu0 %v224_v22 }
  0x43   :  { %226 = vmatprep.subr.bf16.mxu0 %v313_v0 }
  0x46   :  { %228 = vmatpush3.bf16.msra.mxu0 %v227_v25 }
  0x49   :  { %203 = vmatmul.mubr.f32.vlgmr.msra.gmra.mrb[0].mxu0 %v41_v26 }
 0x11c   :  { %v131_v28 = vpop.f32.mrb[0].mxu0 }
 0x11d   :  { %v132_v29 = vadd.f32 %v152_v27, %v131_v28  ;;  %v204_v30 = vpop.f32.mrb[1].mxu0 }
 0x11f   :  { %135 = vst [vmem:[#allocation7] sm:$0xf] %v132_v29 }
 0x120   :  { %292 = shalt.err (!%p289_p6)
}
 0x121   :  { %s293_s16 = scalar_lea.hbm %s386_s3, 64 }
 0x122   :  { %p294_p7 = scmp.ne.s32.totalorder %s386_s3, %s293_s16  ;;  %p297_p8 = scmp.lt.u32.totalorder %s293_s16, %s386_s3 }
 0x124   :  { %p299_p9 = pnand %p297_p8, %p294_p7 }
 0x126   :  { %302 = shalt.err (!%p299_p9)
}
 0x127   :  { %145 = dma.vmem_to_hbm [thread:$0]  %s143_s12, 64, %s386_s3, [#allocation4]  }
 0x128   :  { %307 = dma.done.wait [#allocation4], 64  }
 0x129   :  { %308 = vsyncadd [#allocation4], 4294967232 }
 0x12a   :  { %149 = vsyncpa [#allocation3], 1 }
 0x12b   :  { %150 = vsyncpa [#allocation6], 1 }
 0x12c   :  { %151 = vsyncpa [#allocation4], 1 }

</bundles_post_ra>
